<compile_context>
chip_gen: v7x
topology: tpu7x:2x2x1
jax: 0.10.0
libtpu: 0.0.40
codegen_flags: <defaults>
</compile_context>

<pallas_src>
import functools
import math

import jax
import jax.numpy as jnp
from jax.experimental import pallas as pl
from jax.experimental.pallas import tpu as pltpu

# Geometry fixed by the module (Linear(288, 64) after two VALID 3x3 convs).
K = 3                      # conv kernel size
H0, C0 = 7, 3              # input spatial / channels (NHWC)
H1 = H0 - K + 1            # 5
H2 = H1 - K + 1            # 3
C_CONV = 32                # conv channels
FC = 64                    # hidden width
D_IN = H0 * H0 * C0        # 147
D_H1 = H1 * H1 * C_CONV    # 800
D_H2 = H2 * H2 * C_CONV    # 288   (== Flatten width seen by the fc layer)


# --------------------------------------------------------------------------
# Kernel: 4 chained bf16 MXU matmuls (f32 accumulate) + f32 bias/ReLU.
# --------------------------------------------------------------------------
def heavynet_kernel(x_ref, w1_ref, b1_ref, w2_ref, b2_ref,
                    w3_ref, b3_ref, wh_ref, bh_ref, out_ref):
    """x_ref: (bt, 147) bf16 NHWC-flattened input tile.
    out_ref: (bt, 128) f32 lane-dense block holding [logits | value | pad]."""
    x = x_ref[...]                                                    # bf16
    h1 = jnp.maximum(
        jnp.dot(x, w1_ref[...], preferred_element_type=jnp.float32)
        + b1_ref[...], 0.0)                                           # (bt, 800) f32
    h2 = jnp.maximum(
        jnp.dot(h1.astype(jnp.bfloat16), w2_ref[...],
                preferred_element_type=jnp.float32)
        + b2_ref[...], 0.0)                                           # (bt, 288) f32
    feat = jnp.maximum(
        jnp.dot(h2.astype(jnp.bfloat16), w3_ref[...],
                preferred_element_type=jnp.float32)
        + b3_ref[...], 0.0)                                           # (bt, 64) f32
    out_ref[...] = (
        jnp.dot(feat.astype(jnp.bfloat16), wh_ref[...],
                preferred_element_type=jnp.float32)
        + bh_ref[...])                                                # (bt, 128) f32


# --------------------------------------------------------------------------
# One-time weight preprocessing (run at parameter-update time, NOT per call).
# --------------------------------------------------------------------------
def conv_as_matmul_weight(w, h_in):
    """PyTorch conv weight (cout, cin, K, K) -> dense (h_in*h_in*cin,
    h_out*h_out*cout) matrix M so that, for NHWC-flattened activations,
    VALID conv == x_flat @ M.  Rows ordered (y_in, x_in, cin); cols ordered
    (y_out, x_out, cout).  Built exactly (outer products only, no dots)."""
    cout, cin, k, _ = w.shape
    h_out = h_in - k + 1
    wt = jnp.transpose(w, (2, 3, 1, 0)).astype(jnp.float32)  # (k, k, cin, cout)
    rows = jnp.arange(h_in)[:, None]
    cols = jnp.arange(h_out)[None, :]
    toe = jnp.zeros((h_in, h_in, cin, h_out, h_out, cout), jnp.float32)
    for kh in range(k):
        sy = (rows == cols + kh).astype(jnp.float32)          # (h_in, h_out)
        for kw in range(k):
            sx = (rows == cols + kw).astype(jnp.float32)      # (h_in, h_out)
            toe = toe + jnp.einsum('iy,jx,co->ijcyxo', sy, sx, wt[kh, kw])
    return toe.reshape(h_in * h_in * cin, h_out * h_out * cout)


def prepare_params(params, act_n):
    """Fold conv structure / flatten order / head fusion into dense matrices.

    Returns a dict of device arrays (bf16 matmul operands, f32 biases) that the
    jitted forward consumes directly — no per-call weight plumbing."""
    head_n = act_n + 1
    head_pad = ((head_n + 127) // 128) * 128                 # lane-dense width

    w1m = conv_as_matmul_weight(params["w1"], H0)            # (147, 800)
    b1m = jnp.tile(params["b1"], H1 * H1).reshape(1, D_H1)   # (1, 800), cout fastest
    w2m = conv_as_matmul_weight(params["w2"], H1)            # (800, 288)
    b2m = jnp.tile(params["b2"], H2 * H2).reshape(1, D_H2)   # (1, 288)
    # fc consumes the NCHW Flatten; our conv-output columns are NHWC-ordered,
    # so permute the fc weight columns instead of the activations.
    w3m = jnp.transpose(params["w3"].reshape(FC, C_CONV, H2, H2),
                        (2, 3, 1, 0)).reshape(D_H2, FC)      # (288, 64)
    b3m = params["b3"].reshape(1, FC)
    # fused actor|critic head, zero-padded to a lane-dense width.
    wh = jnp.concatenate([params["wa"], params["wc"]], axis=0).T   # (64, act_n+1)
    bh = jnp.concatenate([params["ba"], params["bc"]], axis=0)     # (act_n+1,)
    whm = jnp.zeros((FC, head_pad), jnp.float32).at[:, :head_n].set(wh)
    bhm = jnp.zeros((1, head_pad), jnp.float32).at[:, :head_n].set(bh)

    return dict(
        w1m=w1m.astype(jnp.bfloat16), b1m=b1m.astype(jnp.float32),
        w2m=w2m.astype(jnp.bfloat16), b2m=b2m.astype(jnp.float32),
        w3m=w3m.astype(jnp.bfloat16), b3m=b3m.astype(jnp.float32),
        whm=whm.astype(jnp.bfloat16), bhm=bhm.astype(jnp.float32),
    )


# --------------------------------------------------------------------------
# Forward: activation plumbing + pallas_call only.
# --------------------------------------------------------------------------
def _round_up(n, m):
    return ((n + m - 1) // m) * m


def heavynet_forward(x_nhwc, packed, *, act_n, block_b=None):
    """x_nhwc: (B, 7, 7, 3) float32 (the layout HeavyNet.forward() expects).
    packed: output of prepare_params().  Returns (logits (B, act_n), value (B, 1))."""
    B = x_nhwc.shape[0]
    assert x_nhwc.shape[1:] == (H0, H0, C0), "HeavyNet requires 7x7x3 inputs"
    head_n = act_n + 1
    head_pad = packed["whm"].shape[1]

    # Batch tiling: multiple of 16 (full bf16 sublane groups, unmasked stores),
    # capped at 512 (multiple of the 128/256 MXU M width, tiny vs. VMEM limits
    # even on v7x).  Ragged batches are zero-padded instead of raising.
    if block_b is None:
        bt = min(_round_up(B, 16), 512)
    else:
        bt = _round_up(int(block_b), 16)
    B_pad = _round_up(B, bt)
    grid = (B_pad // bt,)

    x2d = x_nhwc.reshape(B, D_IN).astype(jnp.bfloat16)   # free row-major NHWC flatten
    if B_pad != B:
        x2d = jnp.pad(x2d, ((0, B_pad - B), (0, 0)))

    def resident(arr):                   # full-array block, fetched once, VMEM-resident
        return pl.BlockSpec(arr.shape, lambda i, _nd=arr.ndim: (0,) * _nd)

    flops = 2 * B_pad * (D_IN * D_H1 + D_H1 * D_H2 + D_H2 * FC + FC * head_pad)
    bytes_accessed = (2 * B_pad * D_IN + 4 * B_pad * head_pad
                      + 2 * (D_IN * D_H1 + D_H1 * D_H2 + D_H2 * FC + FC * head_pad)
                      + 4 * (D_H1 + D_H2 + FC + head_pad))

    out = pl.pallas_call(
        heavynet_kernel,
        out_shape=jax.ShapeDtypeStruct((B_pad, head_pad), jnp.float32),
        grid_spec=pltpu.PrefetchScalarGridSpec(
            num_scalar_prefetch=0,
            grid=grid,
            in_specs=[
                pl.BlockSpec((bt, D_IN), lambda i: (i, 0)),
                resident(packed["w1m"]), resident(packed["b1m"]),
                resident(packed["w2m"]), resident(packed["b2m"]),
                resident(packed["w3m"]), resident(packed["b3m"]),
                resident(packed["whm"]), resident(packed["bhm"]),
            ],
            out_specs=pl.BlockSpec((bt, head_pad), lambda i: (i, 0)),
        ),
        compiler_params=pltpu.CompilerParams(
            dimension_semantics=("parallel",)),
        cost_estimate=pl.CostEstimate(flops=flops, transcendentals=0,
                                      bytes_accessed=bytes_accessed),
    )(x2d,
      packed["w1m"], packed["b1m"], packed["w2m"], packed["b2m"],
      packed["w3m"], packed["b3m"], packed["whm"], packed["bhm"])

    logits = out[:B, :act_n]
    value = out[:B, act_n:head_n]
    return logits, value


# --------------------------------------------------------------------------
# Parameter init (deterministic stand-in for layer_init / orthogonal_).
# --------------------------------------------------------------------------
def _orthogonal(key, shape, std):
    out_dim = shape[0]
    fan_in = 1
    for s in shape[1:]:
        fan_in *= s
    big, small = max(out_dim, fan_in), min(out_dim, fan_in)
    a = jax.random.normal(key, (big, small), dtype=jnp.float32)
    q, _ = jnp.linalg.qr(a)                       # orthonormal columns
    q = q if out_dim >= fan_in else q.T
    return (std * q).reshape(shape).astype(jnp.float32)


def init_params(key, act_n):
    ks = jax.random.split(key, 5)
    s2 = math.sqrt(2.0)
    return dict(
        w1=_orthogonal(ks[0], (C_CONV, C0, K, K), s2), b1=jnp.zeros((C_CONV,), jnp.float32),
        w2=_orthogonal(ks[1], (C_CONV, C_CONV, K, K), s2), b2=jnp.zeros((C_CONV,), jnp.float32),
        w3=_orthogonal(ks[2], (FC, D_H2), s2), b3=jnp.zeros((FC,), jnp.float32),
        wa=_orthogonal(ks[3], (act_n, FC), 0.01), ba=jnp.zeros((act_n,), jnp.float32),
        wc=_orthogonal(ks[4], (1, FC), 1.0), bc=jnp.zeros((1,), jnp.float32),
    )


# --------------------------------------------------------------------------
# Pure-JAX reference (mirrors the PyTorch forward exactly, f32).
# --------------------------------------------------------------------------
def heavynet_ref(x_nhwc, params):
    xn = jnp.transpose(x_nhwc, (0, 3, 1, 2))      # NCHW, like x.permute(0,3,1,2)

    def conv(z, w, b):
        y = jax.lax.conv_general_dilated(
            z, w, window_strides=(1, 1), padding="VALID",
            dimension_numbers=("NCHW", "OIHW", "NCHW"))
        return y + b[None, :, None, None]

    a1 = jnp.maximum(conv(xn, params["w1"], params["b1"]), 0.0)
    a2 = jnp.maximum(conv(a1, params["w2"], params["b2"]), 0.0)
    flat = a2.reshape(a2.shape[0], -1)            # NCHW flatten, like nn.Flatten
    feat = jnp.maximum(flat @ params["w3"].T + params["b3"], 0.0)
    logits = feat @ params["wa"].T + params["ba"]
    value = feat @ params["wc"].T + params["bc"]
    return logits, value


if __name__ == "__main__":
    B, act_n = 2, 4
    key = jax.random.PRNGKey(0)
    k_par, k_x = jax.random.split(key)
    params = init_params(k_par, act_n)
    # forward() permutes NHWC -> NCHW, so inputs are NHWC; spatial size 7 is
    # forced by Linear(288, 64):  7 ->conv-> 5 ->conv-> 3,  32*3*3 = 288.
    x = jax.random.normal(k_x, (B, H0, H0, C0), dtype=jnp.float32)

    # One-time weight packing (parameter-update time), then a lean jitted forward.
    packed = jax.tree_util.tree_map(jnp.asarray, prepare_params(params, act_n))
    fwd = jax.jit(functools.partial(heavynet_forward, act_n=act_n))
    logits, value = fwd(x, packed)
    jax.block_until_ready((logits, value))

    ref_logits, ref_value = heavynet_ref(x, params)
    assert logits.shape == (B, act_n) and value.shape == (B, 1)
    # bf16 matmul inputs with f32 accumulation: compare with bf16-class
    # tolerance; any layout / ordering bug would show up as O(1) errors.
    assert jnp.allclose(logits, ref_logits, atol=5e-2, rtol=5e-2), "logits mismatch"
    assert jnp.allclose(value, ref_value, atol=5e-2, rtol=5e-2), "value mismatch"

    print("KERNEL_OK")
</pallas_src>

<mosaic_0001>
module attributes {stable_mosaic.version = 11 : i64} {
  func.func @heavynet_kernel(%arg0: i32, %arg1: memref<16x147xbf16, #tpu.memory_space<vmem>>, %arg2: memref<147x800xbf16, #tpu.memory_space<vmem>>, %arg3: memref<1x800xf32, #tpu.memory_space<vmem>>, %arg4: memref<800x288xbf16, #tpu.memory_space<vmem>>, %arg5: memref<1x288xf32, #tpu.memory_space<vmem>>, %arg6: memref<288x64xbf16, #tpu.memory_space<vmem>>, %arg7: memref<1x64xf32, #tpu.memory_space<vmem>>, %arg8: memref<64x128xbf16, #tpu.memory_space<vmem>>, %arg9: memref<1x128xf32, #tpu.memory_space<vmem>>, %arg10: memref<16x128xf32, #tpu.memory_space<vmem>>) attributes {dimension_semantics = [#tpu.dimension_semantics<parallel>], iteration_bounds = array<i64: 1>, scalar_prefetch = 0 : i64, scratch_operands = 0 : i64, tpu.core_type = #tpu.core_type<tc>, window_params = [{transform_indices = @transform_0, window_bounds = array<i64: 16, 147>}, {pipeline_mode = #tpu.pipeline_mode<synchronous>, transform_indices = @transform_1, window_bounds = array<i64: 147, 800>}, {pipeline_mode = #tpu.pipeline_mode<synchronous>, transform_indices = @transform_2, window_bounds = array<i64: 1, 800>}, {pipeline_mode = #tpu.pipeline_mode<synchronous>, transform_indices = @transform_3, window_bounds = array<i64: 800, 288>}, {pipeline_mode = #tpu.pipeline_mode<synchronous>, transform_indices = @transform_4, window_bounds = array<i64: 1, 288>}, {pipeline_mode = #tpu.pipeline_mode<synchronous>, transform_indices = @transform_5, window_bounds = array<i64: 288, 64>}, {pipeline_mode = #tpu.pipeline_mode<synchronous>, transform_indices = @transform_6, window_bounds = array<i64: 1, 64>}, {pipeline_mode = #tpu.pipeline_mode<synchronous>, transform_indices = @transform_7, window_bounds = array<i64: 64, 128>}, {pipeline_mode = #tpu.pipeline_mode<synchronous>, transform_indices = @transform_8, window_bounds = array<i64: 1, 128>}, {transform_indices = @transform_9, window_bounds = array<i64: 16, 128>}]} {
    %c0 = arith.constant 0 : index
    %c0_0 = arith.constant 0 : index
    %0 = vector.load %arg1[%c0, %c0_0] : memref<16x147xbf16, #tpu.memory_space<vmem>>, vector<16x147xbf16>
    %c0_1 = arith.constant 0 : index
    %c0_2 = arith.constant 0 : index
    %1 = vector.load %arg2[%c0_1, %c0_2] : memref<147x800xbf16, #tpu.memory_space<vmem>>, vector<147x800xbf16>
    %cst = arith.constant dense<0.000000e+00> : vector<16x800xf32>
    %2 = tpu.matmul %0, %1, %cst {dimension_numbers = #tpu.dot_dimension_numbers<[1], [0], [0], [1], [0, 0, 1, 1], [], []>} : vector<16x147xbf16>, vector<147x800xbf16>, vector<16x800xf32> -> vector<16x800xf32>
    %c0_3 = arith.constant 0 : index
    %c0_4 = arith.constant 0 : index
    %3 = vector.load %arg3[%c0_3, %c0_4] : memref<1x800xf32, #tpu.memory_space<vmem>>, vector<1x800xf32>
    %4 = vector.broadcast %3 : vector<1x800xf32> to vector<16x800xf32>
    %5 = arith.addf %2, %4 : vector<16x800xf32>
    %cst_5 = arith.constant 0.000000e+00 : f32
    %6 = vector.broadcast %cst_5 : f32 to vector<16x800xf32>
    %7 = arith.maximumf %5, %6 : vector<16x800xf32>
    %8 = arith.truncf %7 : vector<16x800xf32> to vector<16x800xbf16>
    %c0_6 = arith.constant 0 : index
    %c0_7 = arith.constant 0 : index
    %9 = vector.load %arg4[%c0_6, %c0_7] : memref<800x288xbf16, #tpu.memory_space<vmem>>, vector<800x288xbf16>
    %cst_8 = arith.constant dense<0.000000e+00> : vector<16x288xf32>
    %10 = tpu.matmul %8, %9, %cst_8 {dimension_numbers = #tpu.dot_dimension_numbers<[1], [0], [0], [1], [0, 0, 1, 1], [], []>} : vector<16x800xbf16>, vector<800x288xbf16>, vector<16x288xf32> -> vector<16x288xf32>
    %c0_9 = arith.constant 0 : index
    %c0_10 = arith.constant 0 : index
    %11 = vector.load %arg5[%c0_9, %c0_10] : memref<1x288xf32, #tpu.memory_space<vmem>>, vector<1x288xf32>
    %12 = vector.broadcast %11 : vector<1x288xf32> to vector<16x288xf32>
    %13 = arith.addf %10, %12 : vector<16x288xf32>
    %cst_11 = arith.constant 0.000000e+00 : f32
    %14 = vector.broadcast %cst_11 : f32 to vector<16x288xf32>
    %15 = arith.maximumf %13, %14 : vector<16x288xf32>
    %16 = arith.truncf %15 : vector<16x288xf32> to vector<16x288xbf16>
    %c0_12 = arith.constant 0 : index
    %c0_13 = arith.constant 0 : index
    %17 = vector.load %arg6[%c0_12, %c0_13] : memref<288x64xbf16, #tpu.memory_space<vmem>>, vector<288x64xbf16>
    %cst_14 = arith.constant dense<0.000000e+00> : vector<16x64xf32>
    %18 = tpu.matmul %16, %17, %cst_14 {dimension_numbers = #tpu.dot_dimension_numbers<[1], [0], [0], [1], [0, 0, 1, 1], [], []>} : vector<16x288xbf16>, vector<288x64xbf16>, vector<16x64xf32> -> vector<16x64xf32>
    %c0_15 = arith.constant 0 : index
    %c0_16 = arith.constant 0 : index
    %19 = vector.load %arg7[%c0_15, %c0_16] : memref<1x64xf32, #tpu.memory_space<vmem>>, vector<1x64xf32>
    %20 = vector.broadcast %19 : vector<1x64xf32> to vector<16x64xf32>
    %21 = arith.addf %18, %20 : vector<16x64xf32>
    %cst_17 = arith.constant 0.000000e+00 : f32
    %22 = vector.broadcast %cst_17 : f32 to vector<16x64xf32>
    %23 = arith.maximumf %21, %22 : vector<16x64xf32>
    %24 = arith.truncf %23 : vector<16x64xf32> to vector<16x64xbf16>
    %c0_18 = arith.constant 0 : index
    %c0_19 = arith.constant 0 : index
    %25 = vector.load %arg8[%c0_18, %c0_19] : memref<64x128xbf16, #tpu.memory_space<vmem>>, vector<64x128xbf16>
    %cst_20 = arith.constant dense<0.000000e+00> : vector<16x128xf32>
    %26 = tpu.matmul %24, %25, %cst_20 {dimension_numbers = #tpu.dot_dimension_numbers<[1], [0], [0], [1], [0, 0, 1, 1], [], []>} : vector<16x64xbf16>, vector<64x128xbf16>, vector<16x128xf32> -> vector<16x128xf32>
    %c0_21 = arith.constant 0 : index
    %c0_22 = arith.constant 0 : index
    %27 = vector.load %arg9[%c0_21, %c0_22] : memref<1x128xf32, #tpu.memory_space<vmem>>, vector<1x128xf32>
    %28 = vector.broadcast %27 : vector<1x128xf32> to vector<16x128xf32>
    %29 = arith.addf %26, %28 : vector<16x128xf32>
    %c0_23 = arith.constant 0 : index
    %c0_24 = arith.constant 0 : index
    %30 = vector.load %arg10[%c0_23, %c0_24] : memref<16x128xf32, #tpu.memory_space<vmem>>, vector<16x128xf32>
    tpu.vector_store %arg10[%c0_23, %c0_24], %29 {strides = array<i32>} : memref<16x128xf32, #tpu.memory_space<vmem>>, vector<16x128xf32>,
    return
  }
  func.func @transform_0(%arg0: i32) -> (i32, i32) {
    %c0_i32 = arith.constant 0 : i32
    %c0_i32_0 = arith.constant 0 : i32
    return %arg0, %c0_i32 : i32, i32
  }
  func.func @transform_1(%arg0: i32) -> (i32, i32) {
    %c0_i32 = arith.constant 0 : i32
    %c0_i32_0 = arith.constant 0 : i32
    %c0_i32_1 = arith.constant 0 : i32
    return %c0_i32, %c0_i32_0 : i32, i32
  }
  func.func @transform_2(%arg0: i32) -> (i32, i32) {
    %c0_i32 = arith.constant 0 : i32
    %c0_i32_0 = arith.constant 0 : i32
    %c0_i32_1 = arith.constant 0 : i32
    return %c0_i32, %c0_i32_0 : i32, i32
  }
  func.func @transform_3(%arg0: i32) -> (i32, i32) {
    %c0_i32 = arith.constant 0 : i32
    %c0_i32_0 = arith.constant 0 : i32
    %c0_i32_1 = arith.constant 0 : i32
    return %c0_i32, %c0_i32_0 : i32, i32
  }
  func.func @transform_4(%arg0: i32) -> (i32, i32) {
    %c0_i32 = arith.constant 0 : i32
    %c0_i32_0 = arith.constant 0 : i32
    %c0_i32_1 = arith.constant 0 : i32
    return %c0_i32, %c0_i32_0 : i32, i32
  }
  func.func @transform_5(%arg0: i32) -> (i32, i32) {
    %c0_i32 = arith.constant 0 : i32
    %c0_i32_0 = arith.constant 0 : i32
    %c0_i32_1 = arith.constant 0 : i32
    return %c0_i32, %c0_i32_0 : i32, i32
  }
  func.func @transform_6(%arg0: i32) -> (i32, i32) {
    %c0_i32 = arith.constant 0 : i32
    %c0_i32_0 = arith.constant 0 : i32
    %c0_i32_1 = arith.constant 0 : i32
    return %c0_i32, %c0_i32_0 : i32, i32
  }
  func.func @transform_7(%arg0: i32) -> (i32, i32) {
    %c0_i32 = arith.constant 0 : i32
    %c0_i32_0 = arith.constant 0 : i32
    %c0_i32_1 = arith.constant 0 : i32
    return %c0_i32, %c0_i32_0 : i32, i32
  }
  func.func @transform_8(%arg0: i32) -> (i32, i32) {
    %c0_i32 = arith.constant 0 : i32
    %c0_i32_0 = arith.constant 0 : i32
    %c0_i32_1 = arith.constant 0 : i32
    return %c0_i32, %c0_i32_0 : i32, i32
  }
  func.func @transform_9(%arg0: i32) -> (i32, i32) {
    %c0_i32 = arith.constant 0 : i32
    %c0_i32_0 = arith.constant 0 : i32
    return %arg0, %c0_i32 : i32, i32
  }
}

</mosaic_0001>

<bundles_post_ra>
// kernel: heavynet_forward.1
= control target key start
LH: loop header
LB: loop body
LE: loop exit
PB: predicated region body
PF: predicated region fallthrough
CT: control target
= control target key end

     0   :  { %vm503_vm0 = vcmask 1040384   ;;  %vm504_vm1 = vcmask 1041408   ;;  %vm499_vm2 = vcmask 154624   ;;  %v3137_v31 = vmov 65535   ;;  %s4038_s1 = inlined_call_operand.vmem [shape: bf16[147,800], index: 1, kind: input, shape index: {}]   ;;  %s4039_s0 = inlined_call_operand.vmem [shape: bf16[16,147], index: 0, kind: input, shape index: {}]   ;;  %s4040_s3 = inlined_call_operand.vmem [shape: bf16[800,288], index: 3, kind: input, shape index: {}]   ;;  %s4041_s2 = inlined_call_operand.vmem [shape: f32[1,800], index: 2, kind: input, shape index: {}]   ;;  %s4042_s5 = inlined_call_operand.vmem [shape: bf16[288,64], index: 5, kind: input, shape index: {}]   ;;  %s4043_s4 = inlined_call_operand.vmem [shape: f32[1,288], index: 4, kind: input, shape index: {}]   ;;  %s4044_s7 = inlined_call_operand.vmem [shape: bf16[64,128], index: 7, kind: input, shape index: {}]   ;;  %s4045_s6 = inlined_call_operand.vmem [shape: f32[1,64], index: 6, kind: input, shape index: {}]   ;;  %s4046_s8 = inlined_call_operand.vmem [shape: f32[1,128], index: 8, kind: input, shape index: {}]   ;;  %s4047_s9 = inlined_call_operand.vmem [shape: f32[16,128], index: 9, kind: output, shape index: {}]  }
   0x1   :  { %v2815_v0 = vld [vmem:[%s4038_s1 + $0x4] ss:$28 sps:$4 sm:$0xff]   ;;  %v2817_v1 = vld [vmem:[%s4038_s1 + $0xc] ss:$28 sps:$4 sm:$0xff]   ;;  %v2821_v4 = vld [vmem:[%s4038_s1 + $0x3c] ss:$28 sps:$4 sm:$0xff]  }
   0x2   :  { %528 = vmatprep.subr.bf16.mxu0 %v2815_v0  ;;  %v2819_v2 = vld [vmem:[%s4038_s1] ss:$28 sps:$4 sm:$0xff]   ;;  %v2820_v3 = vld [vmem:[%s4038_s1 + $0x8] ss:$28 sps:$4 sm:$0xff]   ;;  %571 = vmatprep.subr.bf16.mxu1 %v2817_v1  ;;  %v2825_v6 = vld [vmem:[%s4038_s1 + $0x38] ss:$28 sps:$4 sm:$0xff]  }
   0x3   :  { %529 = vmatpush1.bf16.msra.mxu0 %v2819_v2  ;;  %572 = vmatpush1.bf16.msra.mxu1 %v2820_v3  ;;  %v2823_v5 = vld [vmem:[%s4038_s1 + $0x44] ss:$28 sps:$4 sm:$0xff]   ;;  %v2827_v8 = vld [vmem:[%s4038_s1 + $0x74] ss:$28 sps:$4 sm:$0xff]   ;;  %v2829_v9 = vld [vmem:[%s4038_s1 + $0x7c] ss:$28 sps:$4 sm:$0xff]  }
   0x4   :  { %530 = vmatprep.subr.bf16.mxu0 %v2821_v4  ;;  %v2826_v7 = vld [vmem:[%s4038_s1 + $0x40] ss:$28 sps:$4 sm:$0xff]   ;;  %573 = vmatprep.subr.bf16.mxu1 %v2823_v5  ;;  %v2831_v10 = vld [vmem:[%s4038_s1 + $0x70] ss:$28 sps:$4 sm:$0xff]   ;;  %v2832_v11 = vld [vmem:[%s4038_s1 + $0x78] ss:$28 sps:$4 sm:$0xff]  }
   0x5   :  { %v2833_v12 = vld [vmem:[%s4038_s1 + $0xac] ss:$28 sps:$4 sm:$0xff]   ;;  %v2835_v13 = vld [vmem:[%s4038_s1 + $0xb4] ss:$28 sps:$4 sm:$0xff]   ;;  %v2839_v16 = vld [vmem:[%s4038_s1 + $0xe4] ss:$28 sps:$4 sm:$0xff]  }
   0x6   :  { %v2837_v14 = vld [vmem:[%s4038_s1 + $0xa8] ss:$28 sps:$4 sm:$0xff]   ;;  %v2838_v15 = vld [vmem:[%s4038_s1 + $0xb0] ss:$28 sps:$4 sm:$0xff]   ;;  %v2843_v18 = vld [vmem:[%s4038_s1 + $0xe0] ss:$28 sps:$4 sm:$0xff]  }
   0x7   :  { %531 = vmatpush1.bf16.msra.mxu0 %v2825_v6  ;;  %574 = vmatpush1.bf16.msra.mxu1 %v2826_v7  ;;  %v2841_v17 = vld [vmem:[%s4038_s1 + $0xec] ss:$28 sps:$4 sm:$0xff]   ;;  %v2845_v20 = vld [vmem:[%s4038_s1 + $0x11c] ss:$28 sps:$4 sm:$0xff]   ;;  %v2847_v21 = vld [vmem:[%s4038_s1 + $0x124] ss:$28 sps:$4 sm:$0xff]  }
   0x8   :  { %532 = vmatprep.subr.bf16.mxu0 %v2827_v8  ;;  %575 = vmatprep.subr.bf16.mxu1 %v2829_v9  ;;  %v2844_v19 = vld [vmem:[%s4038_s1 + $0xe8] ss:$28 sps:$4 sm:$0xff]   ;;  %v2849_v22 = vld [vmem:[%s4038_s1 + $0x118] ss:$28 sps:$4 sm:$0xff]   ;;  %v2850_v23 = vld [vmem:[%s4038_s1 + $0x120] ss:$28 sps:$4 sm:$0xff]  }
   0x9   :  { %v2851_v24 = vld [vmem:[%s4038_s1 + $0x154] ss:$28 sps:$4 sm:$0xff]   ;;  %v2853_v25 = vld [vmem:[%s4038_s1 + $0x15c] ss:$28 sps:$4 sm:$0xff]   ;;  %v2857_v28 = vld [vmem:[%s4038_s1 + $0x18c] ss:$28 sps:$4 sm:$0xff]  }
   0xa   :  { %v2855_v26 = vld [vmem:[%s4038_s1 + $0x150] ss:$28 sps:$4 sm:$0xff]   ;;  %v2856_v27 = vld [vmem:[%s4038_s1 + $0x158] ss:$28 sps:$4 sm:$0xff]   ;;  %v505_v32 = vsel %vm503_vm0, 4294967295, %v3137_v31  ;;  %v3138_v53 = vmov 0  }
   0xb   :  { %533 = vmatpush1.bf16.msra.mxu0 %v2831_v10  ;;  %576 = vmatpush1.bf16.msra.mxu1 %v2832_v11  ;;  %v2859_v29 = vld [vmem:[%s4038_s1 + $0x194] ss:$28 sps:$4 sm:$0xff]   ;;  %v107_v30 = vld [vmem:[%s4038_s1 + $0x1f8] sm:$0x33]  ;;  %v2873_v33 = vld [vmem:[%s4039_s0 + $0x4] ss:$8 sps:$4 sm:$0xff]  }
   0xc   :  { %534 = vmatprep.subr.bf16.mxu0 %v2833_v12  ;;  %577 = vmatprep.subr.bf16.mxu1 %v2835_v13  ;;  %v2861_v34 = vld [vmem:[%s4038_s1 + $0x188] ss:$28 sps:$4 sm:$0xff]   ;;  %v2862_v36 = vld [vmem:[%s4038_s1 + $0x190] ss:$28 sps:$4 sm:$0xff]   ;;  %v2480_v39 = vcombine.high %v107_v30, %v107_v30  ;;  %v3305_v41 = vsel %vm504_vm1, %v505_v32, 0  ;;  %v2479_v44 = vcombine.low %v107_v30, %v107_v30  ;;  %vm1736_vm3 = vcmask 261120  }
   0xd   :  { %v108_v35 = vld [vmem:[%s4038_s1 + $0x200] sm:$0x33]  ;;  %2486 = vmatprep.mubr.msk.bf16.mxu0 %vm499_vm2, %v2873_v33  ;;  %2487 = vmatprep.mubr.msk.bf16.mxu1 %vm499_vm2, %v2873_v33  ;;  %v2865_v38 = vld [vmem:[%s4038_s1 + $0x1cc] ss:$28 sps:$4 sm:$0xff]   ;;  %v2888_v50 = vld [vmem:[%s4038_s1 + $0x14] ss:$28 sps:$4 sm:$0xff]  }
   0xe   :  { %v2863_v37 = vld [vmem:[%s4038_s1 + $0x1c4] ss:$28 sps:$4 sm:$0xff]   ;;  %v2482_v40 = vcombine.high %v108_v35, %v108_v35  ;;  %v2481_v45 = vcombine.low %v108_v35, %v108_v35  ;;  %v511_v46 = vand.u32 %v2480_v39, %v3305_v41  ;;  %v508_v48 = vand.u32 %v2479_v44, %v3305_v41  ;;  %v2876_v52 = vld [vmem:[%s4038_s1 + $0x18] ss:$28 sps:$4 sm:$0xff]   ;;  %v2886_v54 = vld [vmem:[%s4038_s1 + $0x10] ss:$28 sps:$4 sm:$0xff]  }
   0xf   :  { %535 = vmatpush1.bf16.msra.mxu0 %v2837_v14  ;;  %578 = vmatpush1.bf16.msra.mxu1 %v2838_v15  ;;  %v2867_v42 = vld [vmem:[%s4038_s1 + $0x1c0] ss:$28 sps:$4 sm:$0xff]   ;;  %v2868_v43 = vld [vmem:[%s4038_s1 + $0x1c8] ss:$28 sps:$4 sm:$0xff]   ;;  %v2877_v56 = vld [vmem:[%s4038_s1 + $0x50] ss:$28 sps:$4 sm:$0xff]  }
  0x10   :  { %536 = vmatprep.subr.bf16.mxu0 %v2839_v16  ;;  %579 = vmatprep.subr.bf16.mxu1 %v2841_v17  ;;  %v517_v47 = vand.u32 %v2482_v40, %v3305_v41  ;;  %v514_v49 = vand.u32 %v2481_v45, %v3305_v41  ;;  %v3323_v51 = vld [vmem:[%s4039_s0] ss:$8 sps:$4 sm:$0xff]   ;;  %v2897_v61 = vld [vmem:[%s4038_s1 + $0xbc] ss:$28 sps:$4 sm:$0xff]   ;;  %v2900_v0 = vld [vmem:[%s4038_s1 + $0xf4] ss:$28 sps:$4 sm:$0xff]  }
  0x11   :  { %v2891_v55 = vld [vmem:[%s4038_s1 + $0x4c] ss:$28 sps:$4 sm:$0xff]   ;;  %v2894_v58 = vld [vmem:[%s4038_s1 + $0x84] ss:$28 sps:$4 sm:$0xff]   ;;  %v2895_v63 = vld [vmem:[%s4038_s1 + $0xb8] ss:$28 sps:$4 sm:$0xff]  }
  0x12   :  { %v2889_v57 = vld [vmem:[%s4038_s1 + $0x48] ss:$28 sps:$4 sm:$0xff]   ;;  %v2892_v60 = vld [vmem:[%s4038_s1 + $0x80] ss:$28 sps:$4 sm:$0xff]   ;;  %v2880_v1 = vld [vmem:[%s4038_s1 + $0xf8] ss:$28 sps:$4 sm:$0xff]  }
  0x13   :  { %537 = vmatpush1.bf16.msra.mxu0 %v2843_v18  ;;  %580 = vmatpush1.bf16.msra.mxu1 %v2844_v19  ;;  %v2878_v59 = vld [vmem:[%s4038_s1 + $0x88] ss:$28 sps:$4 sm:$0xff]   ;;  %v2879_v62 = vld [vmem:[%s4038_s1 + $0xc0] ss:$28 sps:$4 sm:$0xff]   ;;  %v2898_v2 = vld [vmem:[%s4038_s1 + $0xf0] ss:$28 sps:$4 sm:$0xff]  }
  0x14   :  { %538 = vmatprep.subr.bf16.mxu0 %v2845_v20  ;;  %581 = vmatprep.subr.bf16.mxu1 %v2847_v21  ;;  %v2903_v3 = vld [vmem:[%s4038_s1 + $0x12c] ss:$28 sps:$4 sm:$0xff]   ;;  %v2906_v6 = vld [vmem:[%s4038_s1 + $0x164] ss:$28 sps:$4 sm:$0xff]   ;;  %v2909_v10 = vld [vmem:[%s4038_s1 + $0x19c] ss:$28 sps:$4 sm:$0xff]  }
  0x15   :  { %v2881_v4 = vld [vmem:[%s4038_s1 + $0x130] ss:$28 sps:$4 sm:$0xff]   ;;  %v2901_v5 = vld [vmem:[%s4038_s1 + $0x128] ss:$28 sps:$4 sm:$0xff]   ;;  %v2904_v8 = vld [vmem:[%s4038_s1 + $0x160] ss:$28 sps:$4 sm:$0xff]  }
  0x16   :  { %v2882_v7 = vld [vmem:[%s4038_s1 + $0x168] ss:$28 sps:$4 sm:$0xff]   ;;  %v2883_v9 = vld [vmem:[%s4038_s1 + $0x1a0] ss:$28 sps:$4 sm:$0xff]   ;;  %v2907_v12 = vld [vmem:[%s4038_s1 + $0x198] ss:$28 sps:$4 sm:$0xff]  }
  0x17   :  { %539 = vmatpush1.bf16.msra.mxu0 %v2849_v22  ;;  %582 = vmatpush1.bf16.msra.mxu1 %v2850_v23  ;;  %v109_v11 = vld [vmem:[%s4038_s1 + $0x208] sm:$0x33]  ;;  %v2912_v13 = vld [vmem:[%s4038_s1 + $0x1d4] ss:$28 sps:$4 sm:$0xff]   ;;  %vm3140_vm4 = vmmov 0   ;;  %vm2363_vm5 = vcmask 523264  }
  0x18   :  { %540 = vmatprep.subr.bf16.mxu0 %v2851_v24  ;;  %583 = vmatprep.subr.bf16.mxu1 %v2853_v25  ;;  %v2884_v14 = vld [vmem:[%s4038_s1 + $0x1d8] ss:$28 sps:$4 sm:$0xff]   ;;  %v2885_v15 = vld [vmem:[%s4038_s1 + $0x210] ss:$0 sps:$4 sm:$0x33]   ;;  %v2484_v16 = vcombine.high %v109_v11, %v109_v11  ;;  %v2483_v18 = vcombine.low %v109_v11, %v109_v11 }
  0x19   :  { %v2910_v17 = vld [vmem:[%s4038_s1 + $0x1d0] ss:$28 sps:$4 sm:$0xff]   ;;  %v526_v20 = vand.u32 %v2885_v15, %v3305_v41  ;;  %v2920_v24 = vld [vmem:[%s4040_s3 + $0x1c] ss:$12 sps:$4 sm:$0xff]   ;;  %v2918_v25 = vld [vmem:[%s4040_s3 + $0x18] ss:$12 sps:$4 sm:$0xff]  }
  0x1a   :  { %v523_v19 = vand.u32 %v2484_v16, %v3305_v41  ;;  %v2917_v21 = vld [vmem:[%s4040_s3 + $0x4] ss:$12 sps:$4 sm:$0xff]   ;;  %v520_v22 = vand.u32 %v2483_v18, %v3305_v41  ;;  %v2915_v23 = vld [vmem:[%s4040_s3] ss:$12 sps:$4 sm:$0xff]   ;;  %v2932_v32 = vld [vmem:[%s4040_s3 + $0x7c] ss:$12 sps:$4 sm:$0xff]  }
  0x1b   :  { %541 = vmatpush1.bf16.msra.mxu0 %v2855_v26  ;;  %584 = vmatpush1.bf16.msra.mxu1 %v2856_v27  ;;  %v2923_v26 = vld [vmem:[%s4040_s3 + $0x34] ss:$12 sps:$4 sm:$0xff]   ;;  %v2921_v27 = vld [vmem:[%s4040_s3 + $0x30] ss:$12 sps:$4 sm:$0xff]   ;;  %v2942_v41 = vld [vmem:[%s4040_s3 + $0xd8] ss:$12 sps:$4 sm:$0xff]  }
  0x1c   :  { %542 = vmatprep.subr.bf16.mxu0 %v2857_v28  ;;  %585 = vmatprep.subr.bf16.mxu1 %v2859_v29  ;;  %v2926_v28 = vld [vmem:[%s4040_s3 + $0x4c] ss:$12 sps:$4 sm:$0xff]   ;;  %v2924_v29 = vld [vmem:[%s4040_s3 + $0x48] ss:$12 sps:$4 sm:$0xff]   ;;  %v2929_v30 = vld [vmem:[%s4040_s3 + $0x64] ss:$12 sps:$4 sm:$0xff]  }
  0x1d   :  { %v2927_v31 = vld [vmem:[%s4040_s3 + $0x60] ss:$12 sps:$4 sm:$0xff]   ;;  %v2933_v35 = vld [vmem:[%s4040_s3 + $0x90] ss:$12 sps:$4 sm:$0xff]   ;;  %v2948_v45 = vld [vmem:[%s4040_s3 + $0x108] ss:$12 sps:$4 sm:$0xff]  }
  0x1e   :  { %v2939_v39 = vld [vmem:[%s4040_s3 + $0xc0] ss:$12 sps:$4 sm:$0xff]   ;;  %v2944_v40 = vld [vmem:[%s4040_s3 + $0xdc] ss:$12 sps:$4 sm:$0xff]  }
  0x1f   :  { %543 = vmatpush1.bf16.msra.mxu0 %v2861_v34  ;;  %586 = vmatpush1.bf16.msra.mxu1 %v2862_v36  ;;  %v2935_v34 = vld [vmem:[%s4040_s3 + $0x94] ss:$12 sps:$4 sm:$0xff]   ;;  %v2938_v36 = vld [vmem:[%s4040_s3 + $0xac] ss:$12 sps:$4 sm:$0xff]  }
  0x20   :  { %544 = vmatprep.subr.bf16.mxu0 %v2863_v37  ;;  %587 = vmatprep.subr.bf16.mxu1 %v2865_v38  ;;  %v2936_v37 = vld [vmem:[%s4040_s3 + $0xa8] ss:$12 sps:$4 sm:$0xff]   ;;  %v2941_v38 = vld [vmem:[%s4040_s3 + $0xc4] ss:$12 sps:$4 sm:$0xff]   ;;  %v2950_v44 = vld [vmem:[%s4040_s3 + $0x10c] ss:$12 sps:$4 sm:$0xff]  }
  0x23   :  { %545 = vmatpush1.bf16.msra.mxu0 %v2867_v42  ;;  %588 = vmatpush1.bf16.msra.mxu1 %v2868_v43  ;;  %v2947_v42 = vld [vmem:[%s4040_s3 + $0xf4] ss:$12 sps:$4 sm:$0xff]   ;;  %v2945_v43 = vld [vmem:[%s4040_s3 + $0xf0] ss:$12 sps:$4 sm:$0xff]  }
  0x24   :  { %546 = vmatprep.subr.bf16.mxu0 %v511_v46  ;;  %589 = vmatprep.subr.bf16.mxu1 %v517_v47  ;;  %v2953_v46 = vld [vmem:[%s4040_s3 + $0x124] ss:$12 sps:$4 sm:$0xff]   ;;  %v2951_v47 = vld [vmem:[%s4040_s3 + $0x120] ss:$12 sps:$4 sm:$0xff]  }
  0x27   :  { %547 = vmatpush1.bf16.msra.mxu0 %v508_v48  ;;  %590 = vmatpush1.bf16.msra.mxu1 %v514_v49  ;;  %v2956_v48 = vld [vmem:[%s4040_s3 + $0x13c] ss:$12 sps:$4 sm:$0xff]   ;;  %v2954_v49 = vld [vmem:[%s4040_s3 + $0x138] ss:$12 sps:$4 sm:$0xff]  }
  0x28   :  { %657 = vmatprep.subr.bf16.mxu1 %v3138_v53  ;;  %614 = vmatprep.subr.bf16.mxu0 %v2888_v50  ;;  %v2959_v50 = vld [vmem:[%s4040_s3 + $0x154] ss:$12 sps:$4 sm:$0xff]  }
  0x2a   :  { %561 = vmatmul.mubr.bf16.vlgmr.msra.gmra.mrb[0].mxu0 %v3323_v51  ;;  %604 = vmatmul.mubr.bf16.vlgmr.msra.gmra.mrb[0].mxu1 %v3323_v51 }
  0x2b   :  { %658 = vmatpush1.bf16.msra.mxu1 %v2876_v52  ;;  %2489 = vmatprep.mubr.msk.bf16.mxu1 %vm499_vm2, %v2873_v33  ;;  %v2962_v52 = vld [vmem:[%s4040_s3 + $0x16c] ss:$12 sps:$4 sm:$0xff]  }
  0x2c   :  { %659 = vmatprep.subr.bf16.mxu1 %v3138_v53  ;;  %615 = vmatpush1.bf16.msra.mxu0 %v2886_v54  ;;  %v2965_v54 = vld [vmem:[%s4040_s3 + $0x184] ss:$12 sps:$4 sm:$0xff]  }
  0x2d   :  { %616 = vmatprep.subr.bf16.mxu0 %v2891_v55  ;;  %2488 = vmatprep.mubr.msk.bf16.mxu0 %vm499_vm2, %v2873_v33  ;;  %v2930_v33 = vld [vmem:[%s4040_s3 + $0x78] ss:$12 sps:$4 sm:$0xff]  }
  0x2e   :  { %v2989_v55 = vld [vmem:[%s4040_s3 + $0x484] ss:$12 sps:$4 sm:$0xff]  }
  0x2f   :  { %660 = vmatpush1.bf16.msra.mxu1 %v2877_v56  ;;  %v2987_v56 = vld [vmem:[%s4040_s3 + $0x480] ss:$12 sps:$4 sm:$0xff]  }
  0x30   :  { %661 = vmatprep.subr.bf16.mxu1 %v3138_v53  ;;  %617 = vmatpush1.bf16.msra.mxu0 %v2889_v57  ;;  %v2995_v57 = vld [vmem:[%s4040_s3 + $0x49c] ss:$12 sps:$4 sm:$0xff]  }
  0x31   :  { %618 = vmatprep.subr.bf16.mxu0 %v2894_v58  ;;  %v2993_v58 = vld [vmem:[%s4040_s3 + $0x498] ss:$12 sps:$4 sm:$0xff]  }
  0x33   :  { %662 = vmatpush1.bf16.msra.mxu1 %v2878_v59  ;;  %v2999_v59 = vld [vmem:[%s4040_s3 + $0xc8] ss:$12 sps:$4 sm:$0xff]  }
  0x34   :  { %663 = vmatprep.subr.bf16.mxu1 %v3138_v53  ;;  %619 = vmatpush1.bf16.msra.mxu0 %v2892_v60  ;;  %v113_v60 = vlaneseq }
  0x35   :  { %620 = vmatprep.subr.bf16.mxu0 %v2897_v61 }
  0x36   :  { %v3543_v61 = vshrl.u32 %v113_v60, 7 }
  0x37   :  { %664 = vmatpush1.bf16.msra.mxu1 %v2879_v62 }
  0x38   :  { %665 = vmatprep.subr.bf16.mxu1 %v3138_v53  ;;  %621 = vmatpush1.bf16.msra.mxu0 %v2895_v63  ;;  %v115_v62 = vsub.s32 0, %v3543_v61  ;;  %v123_v63 = vsub.s32 2, %v3543_v61 }
  0x39   :  { %622 = vmatprep.subr.bf16.mxu0 %v2900_v0  ;;  %v3550_v0 = vld [vmem:[%s4041_s2] sm:$0x7f] }
  0x3b   :  { %666 = vmatpush1.bf16.msra.mxu1 %v2880_v1  ;;  %v119_v1 = vsub.s32 1, %v3543_v61 }
  0x3c   :  { %667 = vmatprep.subr.bf16.mxu1 %v3138_v53  ;;  %623 = vmatpush1.bf16.msra.mxu0 %v2898_v2  ;;  %v127_v2 = vsub.s32 3, %v3543_v61 }
  0x3d   :  { %624 = vmatprep.subr.bf16.mxu0 %v2903_v3  ;;  %v116_v3 = vrot.slane %v3550_v0, %v115_v62 }
  0x3f   :  { %668 = vmatpush1.bf16.msra.mxu1 %v2881_v4  ;;  %v124_v4 = vrot.slane %v3550_v0, %v123_v63 }
  0x40   :  { %669 = vmatprep.subr.bf16.mxu1 %v3138_v53  ;;  %625 = vmatpush1.bf16.msra.mxu0 %v2901_v5  ;;  %v120_v5 = vrot.slane %v3550_v0, %v119_v1 }
  0x41   :  { %626 = vmatprep.subr.bf16.mxu0 %v2906_v6  ;;  %v128_v6 = vrot.slane %v3550_v0, %v127_v2  ;;  %v2998_v2 = vld [vmem:[%s4040_s3 + $0x25c] ss:$12 sps:$4 sm:$0xff]  }
  0x43   :  { %670 = vmatpush1.bf16.msra.mxu1 %v2882_v7 }
  0x44   :  { %671 = vmatprep.subr.bf16.mxu1 %v3138_v53  ;;  %627 = vmatpush1.bf16.msra.mxu0 %v2904_v8 }
  0x45   :  { %628 = vmatprep.subr.bf16.mxu0 %v2909_v10 }
  0x47   :  { %672 = vmatpush1.bf16.msra.mxu1 %v2883_v9 }
  0x48   :  { %673 = vmatprep.subr.bf16.mxu1 %v3138_v53  ;;  %629 = vmatpush1.bf16.msra.mxu0 %v2907_v12 }
  0x49   :  { %630 = vmatprep.subr.bf16.mxu0 %v2912_v13 }
  0x4b   :  { %674 = vmatpush1.bf16.msra.mxu1 %v2884_v14 }
  0x4c   :  { %675 = vmatprep.subr.bf16.mxu1 %v3138_v53  ;;  %631 = vmatpush1.bf16.msra.mxu0 %v2910_v17 }
  0x4d   :  { %632 = vmatprep.subr.bf16.mxu0 %v523_v19 }
  0x4f   :  { %676 = vmatpush1.bf16.msra.mxu1 %v526_v20 }
  0x50   :  { %633 = vmatpush1.bf16.msra.mxu0 %v520_v22  ;;  %1869 = vmatprep.subr.bf16.mxu1 %v2989_v55 }
  0x51   :  { %1740 = vmatprep.subr.bf16.mxu0 %v2917_v21 }
  0x52   :  { %690 = vmatmul.mubr.bf16.vlgmr.msra.gmra.mrb[4].mxu1 %v3323_v51 }
  0x53   :  { %647 = vmatmul.mubr.bf16.vlgmr.msra.gmra.mrb[4].mxu0 %v3323_v51  ;;  %1901 = vmatprep.mubr.bf16.mxu1 %v3138_v53  ;;  %v2957_v51 = vld [vmem:[%s4040_s3 + $0x150] ss:$12 sps:$4 sm:$0xff]   ;;  %v2960_v53 = vld [vmem:[%s4040_s3 + $0x168] ss:$12 sps:$4 sm:$0xff]  }
  0x54   :  { %1741 = vmatpush1.bf16.msra.mxu0 %v2915_v23  ;;  %1870 = vmatpush1.bf16.msra.mxu1 %v2987_v56 }
  0x55   :  { %1742 = vmatprep.subr.bf16.mxu0 %v2920_v24  ;;  %1871 = vmatprep.subr.bf16.mxu1 %v2995_v57 }
  0x58   :  { %1743 = vmatpush1.bf16.msra.mxu0 %v2918_v25  ;;  %1872 = vmatpush1.bf16.msra.mxu1 %v2993_v58  ;;  %v2990_v58 = vld [vmem:[%s4040_s3 + $0x240] ss:$12 sps:$4 sm:$0xff]  }
  0x59   :  { %1744 = vmatprep.subr.bf16.mxu0 %v2923_v26  ;;  %2668 = vmatprep.subr.bf16.mxu1 %v2999_v59 }
  0x5c   :  { %1745 = vmatpush1.bf16.msra.mxu0 %v2921_v27 }
  0x5d   :  { %1746 = vmatprep.subr.bf16.mxu0 %v2926_v28 }
  0x60   :  { %1747 = vmatpush1.bf16.msra.mxu0 %v2924_v29 }
  0x61   :  { %1748 = vmatprep.subr.bf16.mxu0 %v2929_v30 }
  0x64   :  { %1749 = vmatpush1.bf16.msra.mxu0 %v2927_v31 }
  0x65   :  { %1750 = vmatprep.subr.bf16.mxu0 %v2932_v32 }
  0x68   :  { %1751 = vmatpush1.bf16.msra.mxu0 %v2930_v33 }
  0x69   :  { %1752 = vmatprep.subr.bf16.mxu0 %v2935_v34 }
  0x6c   :  { %1753 = vmatpush1.bf16.msra.mxu0 %v2933_v35  ;;  %v2963_v35 = vld [vmem:[%s4040_s3 + $0x180] ss:$12 sps:$4 sm:$0xff]  }
  0x6d   :  { %1754 = vmatprep.subr.bf16.mxu0 %v2938_v36  ;;  %v2968_v36 = vld [vmem:[%s4040_s3 + $0x19c] ss:$12 sps:$4 sm:$0xff]  }
  0x70   :  { %1755 = vmatpush1.bf16.msra.mxu0 %v2936_v37  ;;  %v2966_v37 = vld [vmem:[%s4040_s3 + $0x198] ss:$12 sps:$4 sm:$0xff]  }
  0x71   :  { %1756 = vmatprep.subr.bf16.mxu0 %v2941_v38  ;;  %v2971_v38 = vld [vmem:[%s4040_s3 + $0x1b4] ss:$12 sps:$4 sm:$0xff]  }
  0x74   :  { %1757 = vmatpush1.bf16.msra.mxu0 %v2939_v39  ;;  %v2969_v39 = vld [vmem:[%s4040_s3 + $0x1b0] ss:$12 sps:$4 sm:$0xff]  }
  0x75   :  { %1758 = vmatprep.subr.bf16.mxu0 %v2944_v40  ;;  %v2974_v40 = vld [vmem:[%s4040_s3 + $0x1cc] ss:$12 sps:$4 sm:$0xff]  }
  0x78   :  { %1759 = vmatpush1.bf16.msra.mxu0 %v2942_v41  ;;  %v2972_v41 = vld [vmem:[%s4040_s3 + $0x1c8] ss:$12 sps:$4 sm:$0xff]  }
  0x79   :  { %1760 = vmatprep.subr.bf16.mxu0 %v2947_v42  ;;  %v2977_v42 = vld [vmem:[%s4040_s3 + $0x1e4] ss:$12 sps:$4 sm:$0xff]  }
  0x7c   :  { %1761 = vmatpush1.bf16.msra.mxu0 %v2945_v43  ;;  %v2975_v43 = vld [vmem:[%s4040_s3 + $0x1e0] ss:$12 sps:$4 sm:$0xff]  }
  0x7d   :  { %1762 = vmatprep.subr.bf16.mxu0 %v2950_v44  ;;  %v2980_v44 = vld [vmem:[%s4040_s3 + $0x1fc] ss:$12 sps:$4 sm:$0xff]  }
  0x80   :  { %1763 = vmatpush1.bf16.msra.mxu0 %v2948_v45  ;;  %v2978_v45 = vld [vmem:[%s4040_s3 + $0x1f8] ss:$12 sps:$4 sm:$0xff]  }
  0x81   :  { %1764 = vmatprep.subr.bf16.mxu0 %v2953_v46  ;;  %v2983_v46 = vld [vmem:[%s4040_s3 + $0x214] ss:$12 sps:$4 sm:$0xff]  }
  0x84   :  { %1765 = vmatpush1.bf16.msra.mxu0 %v2951_v47  ;;  %v2981_v47 = vld [vmem:[%s4040_s3 + $0x210] ss:$12 sps:$4 sm:$0xff]  }
  0x85   :  { %1766 = vmatprep.subr.bf16.mxu0 %v2956_v48  ;;  %v2986_v48 = vld [vmem:[%s4040_s3 + $0x22c] ss:$12 sps:$4 sm:$0xff]  }
  0x88   :  { %1767 = vmatpush1.bf16.msra.mxu0 %v2954_v49  ;;  %v139_v49 = vsub.s32 6, %v3543_v61 }
  0x89   :  { %1768 = vmatprep.subr.bf16.mxu0 %v2959_v50  ;;  %v131_v50 = vsub.s32 4, %v3543_v61 }
  0x8b   :  { %v132_v55 = vrot.slane %v3550_v0, %v131_v50  ;;  %v3033_v50 = vld [vmem:[%s4040_s3 + $0x304] ss:$12 sps:$4 sm:$0xff]  }
  0x8c   :  { %1769 = vmatpush1.bf16.msra.mxu0 %v2957_v51  ;;  %v135_v51 = vsub.s32 5, %v3543_v61 }
  0x8d   :  { %1770 = vmatprep.subr.bf16.mxu0 %v2962_v52  ;;  %v2984_v52 = vld [vmem:[%s4040_s3 + $0x228] ss:$12 sps:$4 sm:$0xff]  }
  0x8e   :  { %v136_v56 = vrot.slane %v3550_v0, %v135_v51  ;;  %v3030_v51 = vld [vmem:[%s4040_s3 + $0x98] ss:$12 sps:$4 sm:$0xff]  }
  0x90   :  { %1771 = vmatpush1.bf16.msra.mxu0 %v2960_v53  ;;  %v140_v53 = vrot.slane %v3550_v0, %v139_v49  ;;  %v3026_v49 = vld [vmem:[%s4040_s3 + $0x2e8] ss:$12 sps:$4 sm:$0xff]  }
  0x91   :  { %1783 = vmatprep.subr.bf16.mxu0 %v2965_v54  ;;  %v2992_v54 = vld [vmem:[%s4040_s3 + $0x244] ss:$12 sps:$4 sm:$0xff]  }
  0xfd   :  { %v562_v7 = vpop.f32.mrb[0].mxu0  ;;  %v605_v8 = vpop.f32.mrb[0].mxu1 }
  0xfe   :  { %v563_v9 = vadd.f32 %v562_v7, %v116_v3  ;;  %v606_v10 = vadd.f32 %v605_v8, %v124_v4  ;;  %v564_v11 = vpop.f32.mrb[1].mxu0  ;;  %v607_v12 = vpop.f32.mrb[1].mxu1 }
  0xff   :  { %v565_v13 = vadd.f32 %v564_v11, %v120_v5  ;;  %v608_v14 = vadd.f32 %v607_v12, %v128_v6  ;;  %v566_v15 = vpop.f32.mrb[2].mxu0  ;;  %v609_v16 = vpop.f32.mrb[2].mxu1 }
 0x100   :  { %v698_v17 = vmax.f32 %v563_v9, 0.0  ;;  %v700_v18 = vmax.f32 %v606_v10, 0.0  ;;  %v567_v19 = vadd.f32 %v566_v15, %v116_v3  ;;  %v610_v20 = vadd.f32 %v609_v16, %v124_v4  ;;  %v568_v21 = vpop.f32.mrb[3].mxu0  ;;  %v611_v22 = vpop.f32.mrb[3].mxu1  ;;  %v2996_v10 = vld [vmem:[%s4040_s3 + $0x258] ss:$12 sps:$4 sm:$0xff]  }
 0x101   :  { %v699_v23 = vmax.f32 %v565_v13, 0.0  ;;  %v569_v24 = vadd.f32 %v568_v21, %v120_v5  ;;  %v612_v25 = vadd.f32 %v611_v22, %v128_v6  ;;  %v701_v28 = vmax.f32 %v608_v14, 0.0  ;;  %v3003_v16 = vld [vmem:[%s4040_s3 + $0x274] ss:$12 sps:$4 sm:$0xff]  }
 0x102   :  { %v705_v26 = vmax.f32 %v567_v19, 0.0  ;;  %v707_v27 = vmax.f32 %v610_v20, 0.0  ;;  %v3000_v19 = vld [vmem:[%s4040_s3 + $0x8] ss:$12 sps:$4 sm:$0xff]   ;;  %v3004_v22 = vld [vmem:[%s4040_s3 + $0xe0] ss:$12 sps:$4 sm:$0xff]  }
 0x103   :  { %v706_v29 = vmax.f32 %v569_v24, 0.0  ;;  %v708_v30 = vmax.f32 %v612_v25, 0.0  ;;  %v3001_v24 = vld [vmem:[%s4040_s3 + $0x270] ss:$12 sps:$4 sm:$0xff]  }
 0x104   :  { %v3564_v31 = vpack.c.bf16 %v705_v26, %v698_v17  ;;  %v3566_v32 = vpack.c.bf16 %v707_v27, %v700_v18  ;;  %v3008_v26 = vld [vmem:[%s4040_s3 + $0x28c] ss:$12 sps:$4 sm:$0xff]  }
 0x105   :  { %v3568_v33 = vpack.c.bf16 %v706_v29, %v699_v23  ;;  %v3570_v34 = vpack.c.bf16 %v708_v30, %v701_v28  ;;  %v3005_v28 = vld [vmem:[%s4040_s3 + $0x20] ss:$12 sps:$4 sm:$0xff]   ;;  %v3009_v29 = vld [vmem:[%s4040_s3 + $0xf8] ss:$12 sps:$4 sm:$0xff]   ;;  %v3006_v30 = vld [vmem:[%s4040_s3 + $0x288] ss:$12 sps:$4 sm:$0xff]  }
 0x107   :  { %1772 = vmatprep.mubr.bf16.mxu0 %v3568_v33 }
 0x108   :  { %1773 = vmatmul.mubr.bf16.vlgmr.msra.gmra.mrb[8].mxu0 %v3564_v31 }
 0x109   :  { %1784 = vmatpush1.bf16.msra.mxu0 %v2963_v35  ;;  %1815 = vmatprep.mubr.bf16.mxu0 %v3570_v34  ;;  %v3013_v35 = vld [vmem:[%s4040_s3 + $0x2a4] ss:$12 sps:$4 sm:$0xff]  }
 0x10a   :  { %1785 = vmatprep.subr.bf16.mxu0 %v2968_v36  ;;  %v3014_v36 = vld [vmem:[%s4040_s3 + $0x110] ss:$12 sps:$4 sm:$0xff]  }
 0x10d   :  { %1786 = vmatpush1.bf16.msra.mxu0 %v2966_v37  ;;  %v3011_v37 = vld [vmem:[%s4040_s3 + $0x2a0] ss:$12 sps:$4 sm:$0xff]  }
 0x10e   :  { %1787 = vmatprep.subr.bf16.mxu0 %v2971_v38  ;;  %v3018_v38 = vld [vmem:[%s4040_s3 + $0x2bc] ss:$12 sps:$4 sm:$0xff]  }
 0x111   :  { %1788 = vmatpush1.bf16.msra.mxu0 %v2969_v39  ;;  %v3015_v39 = vld [vmem:[%s4040_s3 + $0x50] ss:$12 sps:$4 sm:$0xff]  }
 0x112   :  { %1789 = vmatprep.subr.bf16.mxu0 %v2974_v40  ;;  %v3019_v40 = vld [vmem:[%s4040_s3 + $0x128] ss:$12 sps:$4 sm:$0xff]  }
 0x115   :  { %1790 = vmatpush1.bf16.msra.mxu0 %v2972_v41  ;;  %v3016_v41 = vld [vmem:[%s4040_s3 + $0x2b8] ss:$12 sps:$4 sm:$0xff]  }
 0x116   :  { %1791 = vmatprep.subr.bf16.mxu0 %v2977_v42  ;;  %v3023_v42 = vld [vmem:[%s4040_s3 + $0x2d4] ss:$12 sps:$4 sm:$0xff]  }
 0x119   :  { %1792 = vmatpush1.bf16.msra.mxu0 %v2975_v43  ;;  %v3020_v43 = vld [vmem:[%s4040_s3 + $0x68] ss:$12 sps:$4 sm:$0xff]  }
 0x11a   :  { %1793 = vmatprep.subr.bf16.mxu0 %v2980_v44  ;;  %v3024_v44 = vld [vmem:[%s4040_s3 + $0x140] ss:$12 sps:$4 sm:$0xff]  }
 0x11d   :  { %1794 = vmatpush1.bf16.msra.mxu0 %v2978_v45  ;;  %v3021_v45 = vld [vmem:[%s4040_s3 + $0x2d0] ss:$12 sps:$4 sm:$0xff]  }
 0x11e   :  { %1795 = vmatprep.subr.bf16.mxu0 %v2983_v46  ;;  %v3028_v46 = vld [vmem:[%s4040_s3 + $0x2ec] ss:$12 sps:$4 sm:$0xff]  }
 0x121   :  { %1796 = vmatpush1.bf16.msra.mxu0 %v2981_v47  ;;  %v3025_v47 = vld [vmem:[%s4040_s3 + $0x80] ss:$12 sps:$4 sm:$0xff]  }
 0x122   :  { %1797 = vmatprep.subr.bf16.mxu0 %v2986_v48  ;;  %v3029_v48 = vld [vmem:[%s4040_s3 + $0x158] ss:$12 sps:$4 sm:$0xff]  }
 0x125   :  { %1798 = vmatpush1.bf16.msra.mxu0 %v2984_v52  ;;  %v691_v57 = vpop.f32.mrb[4].mxu1  ;;  %v3034_v52 = vld [vmem:[%s4040_s3 + $0x170] ss:$12 sps:$4 sm:$0xff]  }
 0x126   :  { %v692_v59 = vadd.f32 %v691_v57, %v140_v53  ;;  %v693_v60 = vpop.f32.mrb[5].mxu1  ;;  %1799 = vmatprep.subr.bf16.mxu0 %v2992_v54  ;;  %v648_v3 = vpop.f32.mrb[4].mxu0  ;;  %v3038_v54 = vld [vmem:[%s4040_s3 + $0x31c] ss:$12 sps:$4 sm:$0xff]   ;;  %v3036_v57 = vld [vmem:[%s4040_s3 + $0x318] ss:$12 sps:$4 sm:$0xff]  }
 0x127   :  { %v694_v4 = vpop.f32.mrb[6].mxu1  ;;  %v649_v5 = vadd.f32 %v648_v3, %v132_v55  ;;  %v650_v6 = vpop.f32.mrb[5].mxu0  ;;  %v3044_v60 = vld [vmem:[%s4040_s3 + $0x260] ss:$12 sps:$4 sm:$0xff]  }
 0x128   :  { %v695_v7 = vadd.f32 %v694_v4, %v140_v53  ;;  %v696_v8 = vpop.f32.mrb[7].mxu1  ;;  %v651_v0 = vadd.f32 %v650_v6, %v136_v56  ;;  %v652_v9 = vpop.f32.mrb[6].mxu0  ;;  %v704_v14 = vmax.f32 %v692_v59, 0.0  ;;  %v3031_v53 = vld [vmem:[%s4040_s3 + $0x300] ss:$12 sps:$4 sm:$0xff]  }
 0x129   :  { %1800 = vmatpush1.bf16.msra.mxu0 %v2990_v58  ;;  %v702_v11 = vmax.f32 %v649_v5, 0.0  ;;  %v653_v12 = vadd.f32 %v652_v9, %v132_v55  ;;  %v654_v13 = vpop.f32.mrb[7].mxu0  ;;  %v3035_v55 = vld [vmem:[%s4040_s3 + $0xb0] ss:$12 sps:$4 sm:$0xff]   ;;  %v3043_v58 = vld [vmem:[%s4040_s3 + $0x334] ss:$12 sps:$4 sm:$0xff]  }
 0x12a   :  { %v711_v15 = vmax.f32 %v695_v7, 0.0  ;;  %1801 = vmatprep.subr.bf16.mxu0 %v2998_v2  ;;  %v703_v17 = vmax.f32 %v651_v0, 0.0  ;;  %v655_v18 = vadd.f32 %v654_v13, %v136_v56  ;;  %v3039_v56 = vld [vmem:[%s4040_s3 + $0x248] ss:$12 sps:$4 sm:$0xff]   ;;  %v3041_v2 = vld [vmem:[%s4040_s3 + $0x330] ss:$12 sps:$4 sm:$0xff]  }
 0x12b   :  { %v709_v20 = vmax.f32 %v653_v12, 0.0  ;;  %v3040_v59 = vld [vmem:[%s4040_s3 + $0x188] ss:$12 sps:$4 sm:$0xff]   ;;  %v3048_v3 = vld [vmem:[%s4040_s3 + $0x34c] ss:$12 sps:$4 sm:$0xff]  }
 0x12c   :  { %v3644_v21 = vpack.c.bf16 %v711_v15, %v704_v14  ;;  %v710_v23 = vmax.f32 %v655_v18, 0.0  ;;  %v3045_v4 = vld [vmem:[%s4040_s3 + $0x1a0] ss:$12 sps:$4 sm:$0xff]   ;;  %v3049_v5 = vld [vmem:[%s4040_s3 + $0x278] ss:$12 sps:$4 sm:$0xff]  }
 0x12d   :  { %1802 = vmatpush1.bf16.msra.mxu0 %v2996_v10  ;;  %v3652_v25 = vpack.c.bf16 %v709_v20, %v702_v11  ;;  %v3053_v6 = vld [vmem:[%s4040_s3 + $0x364] ss:$12 sps:$4 sm:$0xff]   ;;  %v3051_v8 = vld [vmem:[%s4040_s3 + $0x360] ss:$12 sps:$4 sm:$0xff]   ;;  %v3058_v0 = vld [vmem:[%s4040_s3 + $0x37c] ss:$12 sps:$4 sm:$0xff]  }
 0x12e   :  { %2640 = vmatmul.mubr.msk.bf16.vlgmr.msra.gmra.mrb[8].mxu1 %vm1736_vm3, %v3644_v21  ;;  %1803 = vmatprep.subr.bf16.mxu0 %v3003_v16  ;;  %v3659_v27 = vpack.c.bf16 %v710_v23, %v703_v17  ;;  %v3054_v7 = vld [vmem:[%s4040_s3 + $0x290] ss:$12 sps:$4 sm:$0xff]   ;;  %v3059_v10 = vld [vmem:[%s4040_s3 + $0x2a8] ss:$12 sps:$4 sm:$0xff]   ;;  %v3056_v11 = vld [vmem:[%s4040_s3 + $0x378] ss:$12 sps:$4 sm:$0xff]  }
 0x12f   :  { %2669 = vmatpush3.bf16.msra.mxu1 %v3000_v19  ;;  %1944 = vmatprep.mubr.bf16.mxu1 %v3568_v33  ;;  %v3010_v33 = vld [vmem:[%s4040_s3 + $0x38] ss:$12 sps:$4 sm:$0xff]   ;;  %v3055_v9 = vld [vmem:[%s4040_s3 + $0x1d0] ss:$12 sps:$4 sm:$0xff]   ;;  %v3063_v12 = vld [vmem:[%s4040_s3 + $0x394] ss:$12 sps:$4 sm:$0xff]  }
 0x130   :  { %2670 = vmatprep.subr.bf16.mxu1 %v3004_v22  ;;  %v3060_v13 = vld [vmem:[%s4040_s3 + $0x1e8] ss:$12 sps:$4 sm:$0xff]   ;;  %v3064_v14 = vld [vmem:[%s4040_s3 + $0x2c0] ss:$12 sps:$4 sm:$0xff]   ;;  %v3061_v15 = vld [vmem:[%s4040_s3 + $0x390] ss:$12 sps:$4 sm:$0xff]  }
 0x131   :  { %1804 = vmatpush1.bf16.msra.mxu0 %v3001_v24  ;;  %v3068_v16 = vld [vmem:[%s4040_s3 + $0x3ac] ss:$12 sps:$4 sm:$0xff]   ;;  %v3066_v19 = vld [vmem:[%s4040_s3 + $0x3a8] ss:$12 sps:$4 sm:$0xff]   ;;  %v3073_v20 = vld [vmem:[%s4040_s3 + $0x3c4] ss:$12 sps:$4 sm:$0xff]  }
 0x132   :  { %1805 = vmatprep.subr.bf16.mxu0 %v3008_v26  ;;  %v3065_v17 = vld [vmem:[%s4040_s3 + $0x200] ss:$12 sps:$4 sm:$0xff]   ;;  %v3069_v18 = vld [vmem:[%s4040_s3 + $0x2d8] ss:$12 sps:$4 sm:$0xff]   ;;  %v3074_v23 = vld [vmem:[%s4040_s3 + $0x2f0] ss:$12 sps:$4 sm:$0xff]  }
 0x133   :  { %2671 = vmatpush3.bf16.msra.mxu1 %v3005_v28  ;;  %v3070_v22 = vld [vmem:[%s4040_s3 + $0x218] ss:$12 sps:$4 sm:$0xff]   ;;  %v3071_v24 = vld [vmem:[%s4040_s3 + $0x3c0] ss:$12 sps:$4 sm:$0xff]   ;;  %v3078_v26 = vld [vmem:[%s4040_s3 + $0x3dc] ss:$12 sps:$4 sm:$0xff]  }
 0x134   :  { %2672 = vmatprep.subr.bf16.mxu1 %v3009_v29  ;;  %v3075_v28 = vld [vmem:[%s4040_s3 + $0x230] ss:$12 sps:$4 sm:$0xff]   ;;  %v3079_v29 = vld [vmem:[%s4040_s3 + $0x3c8] ss:$12 sps:$4 sm:$0xff]  }
 0x135   :  { %1806 = vmatpush1.bf16.msra.mxu0 %v3006_v30  ;;  %v3076_v30 = vld [vmem:[%s4040_s3 + $0x3d8] ss:$12 sps:$4 sm:$0xff]  }
 0x136   :  { %1807 = vmatprep.subr.bf16.mxu0 %v3013_v35  ;;  %v3083_v35 = vld [vmem:[%s4040_s3 + $0x3f4] ss:$12 sps:$4 sm:$0xff]  }
 0x137   :  { %2673 = vmatpush3.bf16.msra.mxu1 %v3010_v33  ;;  %v3080_v33 = vld [vmem:[%s4040_s3 + $0x308] ss:$12 sps:$4 sm:$0xff]  }
 0x138   :  { %2674 = vmatprep.subr.bf16.mxu1 %v3014_v36  ;;  %v3084_v36 = vld [vmem:[%s4040_s3 + $0x3e0] ss:$12 sps:$4 sm:$0xff]  }
 0x139   :  { %1808 = vmatpush1.bf16.msra.mxu0 %v3011_v37  ;;  %v3081_v37 = vld [vmem:[%s4040_s3 + $0x3f0] ss:$12 sps:$4 sm:$0xff]  }
 0x13a   :  { %1809 = vmatprep.subr.bf16.mxu0 %v3018_v38  ;;  %v3088_v38 = vld [vmem:[%s4040_s3 + $0x40c] ss:$12 sps:$4 sm:$0xff]  }
 0x13b   :  { %2675 = vmatpush3.bf16.msra.mxu1 %v3015_v39  ;;  %v3085_v39 = vld [vmem:[%s4040_s3 + $0x320] ss:$12 sps:$4 sm:$0xff]  }
 0x13c   :  { %2676 = vmatprep.subr.bf16.mxu1 %v3019_v40  ;;  %v3089_v40 = vld [vmem:[%s4040_s3 + $0x3f8] ss:$12 sps:$4 sm:$0xff]  }
 0x13d   :  { %1810 = vmatpush1.bf16.msra.mxu0 %v3016_v41  ;;  %v3093_v41 = vld [vmem:[%s4040_s3 + $0x424] ss:$12 sps:$4 sm:$0xff]  }
 0x13e   :  { %1811 = vmatprep.subr.bf16.mxu0 %v3023_v42  ;;  %v3094_v42 = vld [vmem:[%s4040_s3 + $0x410] ss:$12 sps:$4 sm:$0xff]  }
 0x13f   :  { %2677 = vmatpush3.bf16.msra.mxu1 %v3020_v43  ;;  %v3091_v43 = vld [vmem:[%s4040_s3 + $0x420] ss:$12 sps:$4 sm:$0xff]  }
 0x140   :  { %2678 = vmatprep.subr.bf16.mxu1 %v3024_v44  ;;  %v3098_v44 = vld [vmem:[%s4040_s3 + $0x43c] ss:$12 sps:$4 sm:$0xff]  }
 0x141   :  { %1812 = vmatpush1.bf16.msra.mxu0 %v3021_v45  ;;  %v3095_v45 = vld [vmem:[%s4040_s3 + $0x350] ss:$12 sps:$4 sm:$0xff]  }
 0x142   :  { %1813 = vmatprep.subr.bf16.mxu0 %v3028_v46  ;;  %v3099_v46 = vld [vmem:[%s4040_s3 + $0x428] ss:$12 sps:$4 sm:$0xff]  }
 0x143   :  { %2679 = vmatpush3.bf16.msra.mxu1 %v3025_v47  ;;  %v3096_v47 = vld [vmem:[%s4040_s3 + $0x438] ss:$12 sps:$4 sm:$0xff]  }
 0x144   :  { %2680 = vmatprep.subr.bf16.mxu1 %v3029_v48  ;;  %v3103_v48 = vld [vmem:[%s4040_s3 + $0x454] ss:$12 sps:$4 sm:$0xff]  }
 0x145   :  { %1814 = vmatpush1.bf16.msra.mxu0 %v3026_v49  ;;  %v3100_v49 = vld [vmem:[%s4040_s3 + $0x368] ss:$12 sps:$4 sm:$0xff]  }
 0x146   :  { %1826 = vmatprep.subr.bf16.mxu0 %v3033_v50  ;;  %v3104_v50 = vld [vmem:[%s4040_s3 + $0x440] ss:$12 sps:$4 sm:$0xff]  }
 0x147   :  { %2681 = vmatpush3.bf16.msra.mxu1 %v3030_v51  ;;  %v3101_v51 = vld [vmem:[%s4040_s3 + $0x450] ss:$12 sps:$4 sm:$0xff]  }
 0x148   :  { %1816 = vmatmul.mubr.bf16.vlgmr.msra.gmra.mrb[8].mxu0 %v3566_v32  ;;  %2682 = vmatprep.subr.bf16.mxu1 %v3034_v52  ;;  %v3108_v52 = vld [vmem:[%s4040_s3 + $0x46c] ss:$12 sps:$4 sm:$0xff]  }
 0x149   :  { %1827 = vmatpush1.bf16.msra.mxu0 %v3031_v53  ;;  %1858 = vmatprep.mubr.bf16.mxu0 %v3659_v27  ;;  %v3105_v53 = vld [vmem:[%s4040_s3 + $0x380] ss:$12 sps:$4 sm:$0xff]  }
 0x14a   :  { %1828 = vmatprep.subr.bf16.mxu0 %v3038_v54  ;;  %v3109_v54 = vld [vmem:[%s4040_s3 + $0x458] ss:$12 sps:$4 sm:$0xff]  }
 0x14b   :  { %2683 = vmatpush3.bf16.msra.mxu1 %v3035_v55  ;;  %v3106_v55 = vld [vmem:[%s4040_s3 + $0x468] ss:$12 sps:$4 sm:$0xff]  }
 0x14c   :  { %2690 = vmatprep.subr.bf16.mxu1 %v3039_v56  ;;  %v3110_v56 = vld [vmem:[%s4040_s3 + $0x398] ss:$12 sps:$4 sm:$0xff]  }
 0x14d   :  { %1829 = vmatpush1.bf16.msra.mxu0 %v3036_v57  ;;  %v3111_v57 = vld [vmem:[%s4040_s3 + $0x470] ss:$12 sps:$4 sm:$0xff]  }
 0x14e   :  { %1945 = vmatmul.mubr.bf16.vlgmr.msra.gmra.mrb[12].mxu1 %v3564_v31  ;;  %1830 = vmatprep.subr.bf16.mxu0 %v3043_v58  ;;  %v3046_v31 = vld [vmem:[%s4040_s3 + $0x348] ss:$12 sps:$4 sm:$0xff]   ;;  %v3112_v58 = vld [vmem:[%s4040_s3 + $0x3b0] ss:$12 sps:$4 sm:$0xff]  }
 0x14f   :  { %2691 = vmatpush3.bf16.msra.mxu1 %v3040_v59  ;;  %1985 = vmatprep.mubr.bf16.mxu1 %v3570_v34  ;;  %v3050_v34 = vld [vmem:[%s4040_s3 + $0x1b8] ss:$12 sps:$4 sm:$0xff]   ;;  %v3113_v59 = vld [vmem:[%s4040_s3 + $0x488] ss:$12 sps:$4 sm:$0xff]  }
 0x150   :  { %2692 = vmatprep.subr.bf16.mxu1 %v3044_v60  ;;  %v3139_v60 = vmov 0.0  }
 0x151   :  { %1831 = vmatpush1.bf16.msra.mxu0 %v3041_v2  ;;  %v3114_v2 = vld [vmem:[%s4040_s3 + $0x4a0] ss:$12 sps:$4 sm:$0xff]  }
 0x152   :  { %1832 = vmatprep.subr.bf16.mxu0 %v3048_v3  ;;  %v3115_v3 = vld [vmem:[%s4042_s5 + $0x40] sm:$0xff]  }
 0x153   :  { %2693 = vmatpush3.bf16.msra.mxu1 %v3045_v4  ;;  %v3117_v4 = vld [vmem:[%s4042_s5 + $0x48] sm:$0xff]  }
 0x154   :  { %2694 = vmatprep.subr.bf16.mxu1 %v3049_v5  ;;  %v3118_v5 = vld [vmem:[%s4042_s5 + $0x8] sm:$0xff]  }
 0x155   :  { %1833 = vmatpush1.bf16.msra.mxu0 %v3046_v31  ;;  %v3120_v31 = vld [vmem:[%s4042_s5 + $0x10] sm:$0xff]  }
 0x156   :  { %1834 = vmatprep.subr.bf16.mxu0 %v3053_v6  ;;  %v3121_v6 = vld [vmem:[%s4042_s5 + $0x58] sm:$0xff]  }
 0x157   :  { %2695 = vmatpush3.bf16.msra.mxu1 %v3050_v34  ;;  %v3122_v34 = vld [vmem:[%s4042_s5 + $0x18] sm:$0xff]  }
 0x158   :  { %2696 = vmatprep.subr.bf16.mxu1 %v3054_v7  ;;  %v3123_v7 = vld [vmem:[%s4042_s5 + $0x60] sm:$0xff]  }
 0x159   :  { %1835 = vmatpush1.bf16.msra.mxu0 %v3051_v8  ;;  %v3124_v8 = vld [vmem:[%s4042_s5 + $0x20] sm:$0xff]  }
 0x15a   :  { %1836 = vmatprep.subr.bf16.mxu0 %v3058_v0  ;;  %v3125_v0 = vld [vmem:[%s4042_s5 + $0x68] sm:$0xff]  }
 0x15b   :  { %2697 = vmatpush3.bf16.msra.mxu1 %v3055_v9  ;;  %v3126_v9 = vld [vmem:[%s4042_s5 + $0x28] sm:$0xff]  }
 0x15c   :  { %2698 = vmatprep.subr.bf16.mxu1 %v3059_v10  ;;  %v3127_v10 = vld [vmem:[%s4042_s5 + $0x70] sm:$0xff]  }
 0x15d   :  { %1837 = vmatpush1.bf16.msra.mxu0 %v3056_v11  ;;  %v3128_v11 = vld [vmem:[%s4042_s5 + $0x30] sm:$0xff]  }
 0x15e   :  { %1838 = vmatprep.subr.bf16.mxu0 %v3063_v12  ;;  %v3129_v12 = vld [vmem:[%s4042_s5 + $0x78] sm:$0xff]  }
 0x15f   :  { %2699 = vmatpush3.bf16.msra.mxu1 %v3060_v13  ;;  %v3130_v13 = vld [vmem:[%s4042_s5 + $0x38] sm:$0xff]  }
 0x160   :  { %2700 = vmatprep.subr.bf16.mxu1 %v3064_v14 }
 0x161   :  { %1839 = vmatpush1.bf16.msra.mxu0 %v3061_v15 }
 0x162   :  { %1840 = vmatprep.subr.bf16.mxu0 %v3068_v16 }
 0x163   :  { %2701 = vmatpush3.bf16.msra.mxu1 %v3065_v17 }
 0x164   :  { %2702 = vmatprep.subr.bf16.mxu1 %v3069_v18 }
 0x165   :  { %1841 = vmatpush1.bf16.msra.mxu0 %v3066_v19 }
 0x166   :  { %1842 = vmatprep.subr.bf16.mxu0 %v3073_v20 }
 0x167   :  { %2703 = vmatpush3.bf16.msra.mxu1 %v3070_v22 }
 0x168   :  { %2704 = vmatprep.subr.bf16.mxu1 %v3074_v23 }
 0x169   :  { %1843 = vmatpush1.bf16.msra.mxu0 %v3071_v24 }
 0x16a   :  { %1844 = vmatprep.subr.bf16.mxu0 %v3078_v26  ;;  %v919_v26 = vld [vmem:[%s4043_s4] sm:$0x7] }
 0x16b   :  { %2705 = vmatpush3.bf16.msra.mxu1 %v3075_v28  ;;  %v932_v28 = vrot.slane %v919_v26, %v123_v63 }
 0x16c   :  { %2712 = vmatprep.subr.bf16.mxu1 %v3079_v29 }
 0x16d   :  { %1845 = vmatpush1.bf16.msra.mxu0 %v3076_v30 }
 0x16e   :  { %1986 = vmatmul.mubr.bf16.vlgmr.msra.gmra.mrb[16].mxu1 %v3566_v32  ;;  %1846 = vmatprep.subr.bf16.mxu0 %v3083_v35  ;;  %v3086_v32 = vld [vmem:[%s4040_s3 + $0x408] ss:$12 sps:$4 sm:$0xff]  }
 0x16f   :  { %2713 = vmatpush3.bf16.msra.mxu1 %v3080_v33  ;;  %2026 = vmatprep.mubr.bf16.mxu1 %v3659_v27  ;;  %v3090_v27 = vld [vmem:[%s4040_s3 + $0x338] ss:$12 sps:$4 sm:$0xff]  }
 0x170   :  { %2714 = vmatprep.subr.bf16.mxu1 %v3084_v36 }
 0x171   :  { %1847 = vmatpush1.bf16.msra.mxu0 %v3081_v37 }
 0x172   :  { %1848 = vmatprep.subr.bf16.mxu0 %v3088_v38 }
 0x173   :  { %2715 = vmatpush3.bf16.msra.mxu1 %v3085_v39 }
 0x174   :  { %2716 = vmatprep.subr.bf16.mxu1 %v3089_v40 }
 0x175   :  { %1849 = vmatpush1.bf16.msra.mxu0 %v3086_v32 }
 0x176   :  { %1850 = vmatprep.subr.bf16.mxu0 %v3093_v41  ;;  %v924_v41 = vrot.slane %v919_v26, %v115_v62 }
 0x177   :  { %2717 = vmatpush3.bf16.msra.mxu1 %v3090_v27  ;;  %v928_v27 = vrot.slane %v919_v26, %v119_v1 }
 0x178   :  { %2718 = vmatprep.subr.bf16.mxu1 %v3094_v42 }
 0x179   :  { %1851 = vmatpush1.bf16.msra.mxu0 %v3091_v43 }
 0x17a   :  { %1852 = vmatprep.subr.bf16.mxu0 %v3098_v44 }
 0x17b   :  { %2719 = vmatpush3.bf16.msra.mxu1 %v3095_v45 }
 0x17c   :  { %2720 = vmatprep.subr.bf16.mxu1 %v3099_v46 }
 0x17d   :  { %1853 = vmatpush1.bf16.msra.mxu0 %v3096_v47 }
 0x17e   :  { %1854 = vmatprep.subr.bf16.mxu0 %v3103_v48 }
 0x17f   :  { %2721 = vmatpush3.bf16.msra.mxu1 %v3100_v49 }
 0x180   :  { %2722 = vmatprep.subr.bf16.mxu1 %v3104_v50 }
 0x181   :  { %1855 = vmatpush1.bf16.msra.mxu0 %v3101_v51 }
 0x182   :  { %1856 = vmatprep.subr.bf16.mxu0 %v3108_v52 }
 0x183   :  { %2723 = vmatpush3.bf16.msra.mxu1 %v3105_v53 }
 0x184   :  { %2724 = vmatprep.subr.bf16.mxu1 %v3109_v54 }
 0x185   :  { %1857 = vmatpush1.bf16.msra.mxu0 %v3106_v55 }
 0x187   :  { %2725 = vmatpush3.bf16.msra.mxu1 %v3110_v56 }
 0x188   :  { %1859 = vmatmul.mubr.bf16.vlgmr.msra.gmra.mrb[8].mxu0 %v3652_v25  ;;  %2726 = vmatprep.subr.bf16.mxu1 %v3111_v57 }
 0x18b   :  { %2727 = vmatpush3.bf16.msra.mxu1 %v3112_v58 }
 0x18c   :  { %2767 = vmatprep.subr.bf16.mxu1 %v3139_v60 }
 0x18e   :  { %2027 = vmatmul.mubr.bf16.vlgmr.msra.gmra.mrb[20].mxu1 %v3652_v25  ;;  %v3116_v25 = vld [vmem:[%s4042_s5] sm:$0xff]  }
 0x18f   :  { %2768 = vmatpush3.bf16.msra.mxu1 %v3113_v59  ;;  %2771 = vmatprep.mubr.msk.bf16.mxu1 %vm3140_vm4, %v3139_v60 }
 0x190   :  { %2769 = vmatprep.subr.bf16.mxu1 %v3139_v60 }
 0x193   :  { %2770 = vmatpush3.bf16.msra.mxu1 %v3114_v2 }
 0x194   :  { %2737 = vmatprep.subr.bf16.mxu1 %v3115_v3 }
 0x196   :  { %2772 = vmatmul.mubr.msk.bf16.vlgmr.msra.gmra.mrb[24].mxu1 %vm1736_vm3, %v3644_v21  ;;  %v3119_v21 = vld [vmem:[%s4042_s5 + $0x50] sm:$0xff]  }
 0x197   :  { %2738 = vmatpush3.bf16.msra.mxu1 %v3116_v25 }
 0x198   :  { %2739 = vmatprep.subr.bf16.mxu1 %v3117_v4  ;;  %v3131_v4 = vld [vmem:[%s4042_s5 + $0x80] sm:$0xff]  }
 0x19b   :  { %2740 = vmatpush3.bf16.msra.mxu1 %v3118_v5 }
 0x19c   :  { %2741 = vmatprep.subr.bf16.mxu1 %v3119_v21 }
 0x19f   :  { %2742 = vmatpush3.bf16.msra.mxu1 %v3120_v31  ;;  %v3132_v31 = vld [vmem:[%s4042_s5 + $0x88] sm:$0xff]  }
 0x1a0   :  { %2743 = vmatprep.subr.bf16.mxu1 %v3121_v6 }
 0x1a3   :  { %2744 = vmatpush3.bf16.msra.mxu1 %v3122_v34 }
 0x1a4   :  { %2745 = vmatprep.subr.bf16.mxu1 %v3123_v7 }
 0x1a7   :  { %2746 = vmatpush3.bf16.msra.mxu1 %v3124_v8 }
 0x1a8   :  { %2747 = vmatprep.subr.bf16.mxu1 %v3125_v0 }
 0x1ab   :  { %2748 = vmatpush3.bf16.msra.mxu1 %v3126_v9 }
 0x1ac   :  { %2749 = vmatprep.subr.bf16.mxu1 %v3127_v10 }
 0x1af   :  { %2750 = vmatpush3.bf16.msra.mxu1 %v3128_v11 }
 0x1b0   :  { %2751 = vmatprep.subr.bf16.mxu1 %v3129_v12  ;;  %v3133_v12 = vld [vmem:[%s4044_s7] sm:$0xff]  }
 0x1b3   :  { %2752 = vmatpush3.bf16.msra.mxu1 %v3130_v13  ;;  %v3134_v13 = vld [vmem:[%s4044_s7 + $0x8] sm:$0xff]  }
 0x1b4   :  { %2775 = vmatprep.subr.bf16.mxu1 %v3139_v60 }
 0x201   :  { %v1903_v14 = vpop.f32.mrb[8].mxu1 }
 0x202   :  { %v1905_v15 = vpop.f32.mrb[9].mxu1 }
 0x203   :  { %v1907_v16 = vpop.f32.mrb[10].mxu1 }
 0x204   :  { %v1909_v17 = vpop.f32.mrb[11].mxu1 }
 0x221   :  { %v2684_v18 = vpop.f32.mrb[12].mxu1 }
 0x222   :  { %v2685_v19 = vpop.f32.mrb[13].mxu1 }
 0x223   :  { %v2686_v20 = vadd.f32 %v2685_v19, %v2684_v18  ;;  %v2687_v22 = vpop.f32.mrb[14].mxu1 }
 0x224   :  { %v2688_v23 = vpop.f32.mrb[15].mxu1 }
 0x225   :  { %v2689_v24 = vadd.f32 %v2688_v23, %v2687_v22  ;;  %v1947_v35 = vadd.f32 %v2686_v20, %v932_v28  ;;  %v2642_v23 = vld [vmem:[%s4045_s6] ss:$0 sm:$0xff] }
 0x227   :  { %v1950_v38 = vadd.f32 %v2689_v24, %v932_v28 }
 0x241   :  { %v2706_v29 = vpop.f32.mrb[16].mxu1 }
 0x242   :  { %v2707_v30 = vpop.f32.mrb[17].mxu1 }
 0x243   :  { %v2708_v33 = vadd.f32 %v2707_v30, %v2706_v29  ;;  %v2709_v36 = vpop.f32.mrb[18].mxu1 }
 0x244   :  { %v2710_v37 = vpop.f32.mrb[19].mxu1 }
 0x245   :  { %v1988_v39 = vadd.f32 %v2708_v33, %v1947_v35  ;;  %v2711_v40 = vadd.f32 %v2710_v37, %v2709_v36 }
 0x247   :  { %v1991_v32 = vadd.f32 %v2711_v40, %v1950_v38 }
 0x25b   :  { %v1860_v42 = vpop.f32.mrb[8].mxu0 }
 0x25c   :  { %v2795_v43 = vadd.f32 %v1860_v42, %v924_v41  ;;  %v1862_v44 = vpop.f32.mrb[9].mxu0 }
 0x25d   :  { %v2797_v63 = vadd.f32 %v1862_v44, %v928_v27  ;;  %v1864_v45 = vpop.f32.mrb[10].mxu0 }
 0x25e   :  { %v2796_v46 = vadd.f32 %v2795_v43, %v1903_v14  ;;  %v2799_v47 = vadd.f32 %v1864_v45, %v924_v41  ;;  %v1866_v48 = vpop.f32.mrb[11].mxu0  ;;  %v3135_v14 = vld [vmem:[%s4044_s7 + $0x10] sm:$0xff]  }
 0x25f   :  { %v2798_v49 = vadd.f32 %v2797_v63, %v1905_v15  ;;  %v2801_v50 = vadd.f32 %v1866_v48, %v928_v27  ;;  %v3136_v15 = vld [vmem:[%s4044_s7 + $0x18] sm:$0xff]  }
 0x260   :  { %v2800_v51 = vadd.f32 %v2799_v47, %v1907_v16  ;;  %v2076_v54 = vmax.f32 %v2796_v46, 0.0 }
 0x261   :  { %v2802_v52 = vadd.f32 %v2801_v50, %v1909_v17  ;;  %v2728_v53 = vpop.f32.mrb[20].mxu1  ;;  %v2077_v62 = vmax.f32 %v2798_v49, 0.0 }
 0x262   :  { %v2079_v55 = vmax.f32 %v2800_v51, 0.0  ;;  %v2729_v56 = vpop.f32.mrb[21].mxu1 }
 0x263   :  { %v2080_v57 = vmax.f32 %v2802_v52, 0.0  ;;  %v2730_v61 = vadd.f32 %v2729_v56, %v2728_v53  ;;  %v2731_v1 = vpop.f32.mrb[22].mxu1 }
 0x264   :  { %v2082_v58 = vpack.c.bf16 %v2079_v55, %v2076_v54  ;;  %v2732_v59 = vpop.f32.mrb[23].mxu1 }
 0x265   :  { %v2733_v2 = vadd.f32 %v2732_v59, %v2731_v1  ;;  %v2083_v3 = vpack.c.bf16 %v2080_v57, %v2077_v62  ;;  %v2029_v25 = vadd.f32 %v2730_v61, %v1988_v39  ;;  %v2662_v39 = vld [vmem:[%s4046_s8] ss:$0 sm:$0xff] }
 0x267   :  { %2271 = vmatprep.mubr.bf16.mxu1 %v2083_v3  ;;  %v2032_v5 = vadd.f32 %v2733_v2, %v1991_v32 }
 0x268   :  { %2272 = vmatmul.mubr.bf16.vlgmr.msra.gmra.mrb[28].mxu1 %v2082_v58 }
 0x269   :  { %v2069_v21 = vpop.f32.mrb[24].mxu1  ;;  %2776 = vmatpush3.bf16.msra.mxu1 %v3131_v4  ;;  %2779 = vmatprep.mubr.msk.bf16.mxu1 %vm3140_vm4, %v3139_v60 }
 0x26a   :  { %v2070_v6 = vadd.f32 %v2069_v21, %v2029_v25  ;;  %v2773_v34 = vpop.f32.mrb[25].mxu1  ;;  %2777 = vmatprep.subr.bf16.mxu1 %v3139_v60 }
 0x26b   :  { %v2072_v7 = vpop.f32.mrb[26].mxu1 }
 0x26c   :  { %v2073_v8 = vadd.f32 %v2072_v7, %v2032_v5  ;;  %v2774_v0 = vpop.f32.mrb[27].mxu1  ;;  %v2078_v9 = vmax.f32 %v2070_v6, 0.0 }
 0x26d   :  { %2778 = vmatpush3.bf16.msra.mxu1 %v3132_v31 }
 0x26e   :  { %v2081_v10 = vmax.f32 %v2073_v8, 0.0  ;;  %2783 = vmatprep.subr.bf16.mxu1 %v3139_v60 }
 0x270   :  { %v2084_v11 = vpack.c.bf16 %v2081_v10, %v2078_v9 }
 0x272   :  { %2780 = vmatmul.mubr.msk.bf16.vlgmr.msra.gmra.mrb[32].mxu1 %vm1736_vm3, %v2084_v11 }
 0x273   :  { %2791 = vmatprep.mubr.msk.bf16.mxu1 %vm3140_vm4, %v3139_v60  ;;  %2784 = vmatpush3.bf16.msra.mxu1 %v3133_v12 }
 0x274   :  { %2785 = vmatprep.subr.bf16.mxu1 %v3139_v60 }
 0x277   :  { %2786 = vmatpush3.bf16.msra.mxu1 %v3134_v13 }
 0x278   :  { %2787 = vmatprep.subr.bf16.mxu1 %v3139_v60 }
 0x27b   :  { %2788 = vmatpush3.bf16.msra.mxu1 %v3135_v14 }
 0x27c   :  { %2789 = vmatprep.subr.bf16.mxu1 %v3139_v60 }
 0x27f   :  { %2790 = vmatpush3.bf16.msra.mxu1 %v3136_v15 }
 0x33b   :  { %v2753_v16 = vpop.f32.mrb[28].mxu1 }
 0x33c   :  { %v2754_v17 = vpop.f32.mrb[29].mxu1 }
 0x33d   :  { %v2755_v18 = vadd.f32 %v2754_v17, %v2753_v16  ;;  %v2756_v19 = vpop.f32.mrb[30].mxu1 }
 0x33e   :  { %v2757_v20 = vpop.f32.mrb[31].mxu1 }
 0x33f   :  { %v2758_v22 = vadd.f32 %v2757_v20, %v2756_v19  ;;  %v2274_v24 = vadd.f32 %v2755_v18, %v2642_v23 }
 0x341   :  { %v2277_v60 = vadd.f32 %v2758_v22, %v2642_v23 }
 0x345   :  { %v2314_v26 = vpop.f32.mrb[32].mxu1 }
 0x346   :  { %v2315_v28 = vadd.f32 %v2314_v26, %v2274_v24  ;;  %v2781_v29 = vpop.f32.mrb[33].mxu1 }
 0x347   :  { %v2317_v30 = vpop.f32.mrb[34].mxu1 }
 0x348   :  { %v2318_v35 = vadd.f32 %v2317_v30, %v2277_v60  ;;  %v2782_v33 = vpop.f32.mrb[35].mxu1  ;;  %v2321_v36 = vmax.f32 %v2315_v28, 0.0 }
 0x34a   :  { %v2322_v37 = vmax.f32 %v2318_v35, 0.0 }
 0x34c   :  { %v2323_v38 = vpack.c.bf16 %v2322_v37, %v2321_v36 }
 0x34e   :  { %2792 = vmatmul.mubr.msk.bf16.vlgmr.msra.gmra.mrb[36].mxu1 %vm2363_vm5, %v2323_v38 }
 0x421   :  { %v2401_v40 = vpop.f32.mrb[36].mxu1 }
 0x422   :  { %v2402_v32 = vadd.f32 %v2662_v39, %v2401_v40  ;;  %v2793_v41 = vpop.f32.mrb[37].mxu1 }
 0x423   :  { %v2404_v27 = vpop.f32.mrb[38].mxu1 }
 0x424   :  { %2408 = vst [vmem:[%s4047_s9] sm:$0xff] %v2402_v32  ;;  %v2405_v42 = vadd.f32 %v2662_v39, %v2404_v27  ;;  %v2794_v43 = vpop.f32.mrb[39].mxu1 }
 0x426   :  { %2409 = vst [vmem:[%s4047_s9 + $0x8] sm:$0xff] %v2405_v42 }

</bundles_post_ra>
